<compile_context>
chip_gen: v7x
topology: tpu7x:2x2x1
jax: 0.10.0
libtpu: 0.0.40
codegen_flags: <defaults>
</compile_context>

<pallas_src>
import functools
import math

import jax
import jax.numpy as jnp
from jax.experimental import pallas as pl
from jax.experimental.pallas import tpu as pltpu


# ----------------------------------------------------------------------------
# Tiling / VMEM helpers
# ----------------------------------------------------------------------------
def _round_up(x, m):
    return ((x + m - 1) // m) * m


def _pick_divisor_tile(dim, target, base):
    """Largest multiple of `base` <= target that divides `dim`; else `dim`."""
    if dim <= target:
        return dim
    t = (target // base) * base
    while t >= base:
        if dim % t == 0:
            return t
        t -= base
    return dim


def _tile_and_pad(dim, target, base):
    """Return (tile, padded_dim).  If no clean divisor <= target exists, pad
    `dim` up to a multiple of the (base-aligned) target tile; the caller adds
    the zero padding and slices it off the result."""
    t = _pick_divisor_tile(dim, target, base)
    if t != dim or dim <= target:
        return t, dim
    t = max((target // base) * base, base)
    return t, _round_up(dim, t)


def _vmem_limit(need_bytes, lo=16 * 1024 * 1024, hi=48 * 1024 * 1024):
    """Scoped-VMEM request: 2x the estimated per-step footprint, clamped so we
    never ask for the whole 64 MiB of a v7x TensorCore."""
    return int(min(max(2 * need_bytes, lo), hi))


# ----------------------------------------------------------------------------
# Kernel 1: tiled dense projection  y = x @ Wt + b
#   grid = (Mp//tm, Np//tn, Kp//tk), K innermost (accumulator axis).
# ----------------------------------------------------------------------------
def _linear_kernel(x_ref, w_ref, b_ref, o_ref, acc_ref):
    k_idx = pl.program_id(2)

    @pl.when(k_idx == 0)
    def _():
        acc_ref[...] = jnp.zeros_like(acc_ref)

    # MXU runs at native input rate; f32 accumulation via preferred_element_type.
    acc_ref[...] += jnp.dot(x_ref[...], w_ref[...],
                            preferred_element_type=jnp.float32)

    @pl.when(k_idx == pl.num_programs(2) - 1)
    def _():
        # Bias added once at finalize (not per K step).
        o_ref[...] = (acc_ref[...] + b_ref[...].astype(jnp.float32)).astype(o_ref.dtype)


def linear(x2d, w_t, b, *, tm=512, tn=512, tk=512):
    M, K = x2d.shape
    N = w_t.shape[1]
    tm, Mp = _tile_and_pad(M, tm, 8)     # sublane dim of x / out
    tk, Kp = _tile_and_pad(K, tk, 128)   # lane dim of x, sublane dim of w
    tn, Np = _tile_and_pad(N, tn, 128)   # lane dim of w / out

    # Zero-pad awkward shapes up front (zero rows/cols contribute 0 to the dot).
    if (Mp, Kp) != (M, K):
        x2d = jnp.pad(x2d, ((0, Mp - M), (0, Kp - K)))
    if (Kp, Np) != (K, N):
        w_t = jnp.pad(w_t, ((0, Kp - K), (0, Np - N)))
    if Np != N:
        b = jnp.pad(b, (0, Np - N))

    grid = (Mp // tm, Np // tn, Kp // tk)
    itemsize = jnp.dtype(x2d.dtype).itemsize
    vmem_need = (2 * (tm * tk + tk * tn + tm * tn + tn)) * itemsize + tm * tn * 4

    out = pl.pallas_call(
        _linear_kernel,
        out_shape=jax.ShapeDtypeStruct((Mp, Np), x2d.dtype),
        grid_spec=pltpu.PrefetchScalarGridSpec(
            num_scalar_prefetch=0,
            grid=grid,
            in_specs=[
                pl.BlockSpec((tm, tk), lambda i, j, k: (i, k)),
                pl.BlockSpec((tk, tn), lambda i, j, k: (k, j)),
                pl.BlockSpec((1, tn), lambda i, j, k: (0, j)),
            ],
            out_specs=pl.BlockSpec((tm, tn), lambda i, j, k: (i, j)),
            scratch_shapes=[pltpu.VMEM((tm, tn), jnp.float32)],
        ),
        compiler_params=pltpu.CompilerParams(
            dimension_semantics=("parallel", "parallel", "arbitrary"),
            vmem_limit_bytes=_vmem_limit(vmem_need),
        ),
    )(x2d, w_t, b.reshape(1, Np))

    if (Mp, Np) != (M, N):
        out = out[:M, :N]
    return out


# ----------------------------------------------------------------------------
# Kernel 2a: flash (online-softmax) attention, one grid step per (batch, head,
# KV tile).  Used when head_dim is lane-aligned (hd % 128 == 0).
#   q   (B, H, S,  hd) -> block (S,  hd)   at (b, h, 0, 0)
#   k,v (B, H, S,  hd) -> block (tkv, hd)  at (b, h, j, 0)
#   out (B, S, D)      -> block (S,  hd)   at (b, 0, h)   (transpose absorbed)
# ----------------------------------------------------------------------------
def _flash_attn_kernel(q_ref, k_ref, v_ref, o_ref, m_ref, l_ref, acc_ref, *, scale):
    j = pl.program_id(2)

    @pl.when(j == 0)
    def _():
        m_ref[...] = jnp.full_like(m_ref, -jnp.inf)
        l_ref[...] = jnp.zeros_like(l_ref)
        acc_ref[...] = jnp.zeros_like(acc_ref)

    # Fold 1/sqrt(dim) into q: S*hd multiplies instead of S*tkv.
    q = q_ref[...] * jnp.asarray(scale, dtype=q_ref.dtype)
    # Contraction on the last dims of both operands -> no materialised k^T.
    s = jnp.einsum("qd,kd->qk", q, k_ref[...], preferred_element_type=jnp.float32)

    m_prev = m_ref[...]
    m_new = jnp.maximum(m_prev, jnp.max(s, axis=-1, keepdims=True))
    alpha = jnp.exp(m_prev - m_new)
    p = jnp.exp(s - m_new)

    l_ref[...] = alpha * l_ref[...] + jnp.sum(p, axis=-1, keepdims=True)
    acc_ref[...] = alpha * acc_ref[...] + jnp.einsum(
        "qk,kd->qd", p.astype(v_ref.dtype), v_ref[...],
        preferred_element_type=jnp.float32)
    m_ref[...] = m_new

    @pl.when(j == pl.num_programs(2) - 1)
    def _():
        l = l_ref[...]
        # EUP reciprocal (separate VLIW slot) + one Newton step; normalisation
        # is a multiply on (S, hd), never a divide on (S, S).
        inv = pl.reciprocal(l, approx=True)
        inv = inv * (2.0 - l * inv)
        o_ref[...] = (acc_ref[...] * inv).astype(o_ref.dtype)


def _attention_flash(q4, k4, v4, *, scale, kv_tile=512):
    B, H, S, hd = q4.shape
    D = H * hd

    # KV tile: prefer a 128-multiple divisor of S (MXU-friendly PV contraction),
    # then an 8-multiple divisor; otherwise one full-length tile (padding keys
    # without masking would corrupt the softmax).
    # TODO(synk): masked ragged KV tiles for sequence lengths with no small divisor.
    tkv = _pick_divisor_tile(S, kv_tile, 128)
    if tkv == S and S > kv_tile:
        tkv = _pick_divisor_tile(S, kv_tile, 8)
    n_kv = S // tkv

    vmem_need = 4 * (2 * (2 * S * hd + 2 * tkv * hd)   # q, out, k, v (double-buffered)
                     + 2 * S * 128 + S * hd            # m, l (lane-padded), acc scratch
                     + 2 * S * tkv)                    # score / prob intermediates

    return pl.pallas_call(
        functools.partial(_flash_attn_kernel, scale=scale),
        out_shape=jax.ShapeDtypeStruct((B, S, D), q4.dtype),
        grid_spec=pltpu.PrefetchScalarGridSpec(
            num_scalar_prefetch=0,
            grid=(B, H, n_kv),
            in_specs=[
                pl.BlockSpec((None, None, S, hd), lambda b, h, j: (b, h, 0, 0)),
                pl.BlockSpec((None, None, tkv, hd), lambda b, h, j: (b, h, j, 0)),
                pl.BlockSpec((None, None, tkv, hd), lambda b, h, j: (b, h, j, 0)),
            ],
            out_specs=pl.BlockSpec((None, S, hd), lambda b, h, j: (b, 0, h)),
            scratch_shapes=[
                pltpu.VMEM((S, 1), jnp.float32),   # running max m
                pltpu.VMEM((S, 1), jnp.float32),   # running denom l
                pltpu.VMEM((S, hd), jnp.float32),  # output accumulator
            ],
        ),
        compiler_params=pltpu.CompilerParams(
            dimension_semantics=("parallel", "parallel", "arbitrary"),
            vmem_limit_bytes=_vmem_limit(vmem_need),
        ),
    )(q4, k4, v4)


# ----------------------------------------------------------------------------
# Kernel 2b: fallback for hd < 128 (lane-padded heads): one grid step per
# batch, heads unrolled in-kernel so only one (S, S) score matrix is live at a
# time; each head's result is written with a direct slice store (no concat).
# ----------------------------------------------------------------------------
def _mha_small_head_kernel(q_ref, k_ref, v_ref, o_ref, *, scale):
    H, S, hd = q_ref.shape
    for h in range(H):  # static unroll
        qh = q_ref[h] * jnp.asarray(scale, dtype=q_ref.dtype)
        kh = k_ref[h]
        vh = v_ref[h]
        s = jnp.einsum("qd,kd->qk", qh, kh, preferred_element_type=jnp.float32)
        m = jnp.max(s, axis=-1, keepdims=True)
        p = jnp.exp(s - m)
        l = jnp.sum(p, axis=-1, keepdims=True)
        inv = pl.reciprocal(l, approx=True)
        inv = inv * (2.0 - l * inv)
        att = jnp.einsum("qk,kd->qd", p.astype(vh.dtype), vh,
                         preferred_element_type=jnp.float32) * inv
        # Direct per-head slice store into the lane-dense (S, D) output slab.
        o_ref[:, h * hd:(h + 1) * hd] = att.astype(o_ref.dtype)


def _attention_small_heads(q4, k4, v4, *, scale):
    # TODO(synk): add a flash (online-softmax) variant of this hd < 128 path too.
    B, H, S, hd = q4.shape
    D = H * hd
    in_spec = pl.BlockSpec((None, H, S, hd), lambda b: (b, 0, 0, 0))
    vmem_need = 4 * (2 * (3 * H * S * hd + S * D) + 2 * S * S + 2 * S * hd)
    return pl.pallas_call(
        functools.partial(_mha_small_head_kernel, scale=scale),
        out_shape=jax.ShapeDtypeStruct((B, S, D), q4.dtype),
        grid=(B,),
        in_specs=[in_spec, in_spec, in_spec],
        out_specs=pl.BlockSpec((None, S, D), lambda b: (b, 0, 0)),
        compiler_params=pltpu.CompilerParams(
            dimension_semantics=("parallel",),
            vmem_limit_bytes=_vmem_limit(vmem_need),
        ),
    )(q4, k4, v4)


# ----------------------------------------------------------------------------
# Full forward
# ----------------------------------------------------------------------------
def multi_head_attention(q, k, v, params, num_heads, *, kv_tile=512):
    B, S, D = q.shape
    hd = D // num_heads

    # Projections.  Self-attention fast path: one fused (D, 3D) GEMM reads the
    # activations from HBM once instead of three times.
    if q is k and q is v:
        w_cat = jnp.concatenate([params["wq_t"], params["wk_t"], params["wv_t"]], axis=1)
        b_cat = jnp.concatenate([params["bq"], params["bk"], params["bv"]])
        qkv = linear(q.reshape(B * S, D), w_cat, b_cat)
        q_p, k_p, v_p = qkv[:, :D], qkv[:, D:2 * D], qkv[:, 2 * D:]
    else:
        q_p = linear(q.reshape(B * S, D), params["wq_t"], params["bq"])
        k_p = linear(k.reshape(B * S, D), params["wk_t"], params["bk"])
        v_p = linear(v.reshape(B * S, D), params["wv_t"], params["bv"])

    # Head split exactly as the module does it: reshape(B, H, S, hd), NO transpose
    # (pure metadata reshape of a contiguous array).
    q4 = q_p.reshape(B, num_heads, S, hd)
    k4 = k_p.reshape(B, num_heads, S, hd)
    v4 = v_p.reshape(B, num_heads, S, hd)

    scale = 1.0 / math.sqrt(D)   # module quirk: 1/sqrt(dim), not 1/sqrt(head_dim)
    if hd % 128 == 0:
        # Lane-aligned heads: per-(batch, head, KV-tile) flash kernel; output
        # BlockSpec places each head's (S, hd) slab, absorbing transpose+reshape.
        return _attention_flash(q4, k4, v4, scale=scale, kv_tile=kv_tile)
    # hd < 128 (lane-padded heads): per-batch kernel, heads unrolled in-kernel.
    return _attention_small_heads(q4, k4, v4, scale=scale)


# ----------------------------------------------------------------------------
# Pure-JAX reference (same math, no Pallas) for correctness checks
# ----------------------------------------------------------------------------
def reference(q, k, v, params, num_heads):
    B, S, D = q.shape
    hd = D // num_heads
    q_p = q @ params["wq_t"] + params["bq"]
    k_p = k @ params["wk_t"] + params["bk"]
    v_p = v @ params["wv_t"] + params["bv"]
    q4 = q_p.reshape(B, num_heads, S, hd)
    k4 = k_p.reshape(B, num_heads, S, hd)
    v4 = v_p.reshape(B, num_heads, S, hd)
    s = jnp.einsum("bhqd,bhkd->bhqk", q4, k4) / math.sqrt(D)
    p = jax.nn.softmax(s, axis=-1)
    att = jnp.einsum("bhqk,bhkd->bhqd", p, v4)
    return jnp.transpose(att, (0, 2, 1, 3)).reshape(B, S, -1)


if __name__ == "__main__":
    def make_params(key, dim):
        kwq, kwk, kwv, kbq, kbk, kbv = jax.random.split(key, 6)
        bound = 1.0 / math.sqrt(dim)   # matches nn.Linear default init scale
        u = functools.partial(jax.random.uniform, dtype=jnp.float32,
                              minval=-bound, maxval=bound)
        return {"wq_t": u(kwq, (dim, dim)), "wk_t": u(kwk, (dim, dim)),
                "wv_t": u(kwv, (dim, dim)),
                "bq": u(kbq, (dim,)), "bk": u(kbk, (dim,)), "bv": u(kbv, (dim,))}

    root = jax.random.PRNGKey(0)
    key1, key2, key3, key4, key5, key6 = jax.random.split(root, 6)

    # --- Case 1: small head_dim (hd = 8) -> per-batch fallback kernel -------
    B, S, D, H = 2, 8, 32, 4
    q = jax.random.normal(key1, (B, S, D), jnp.float32)
    k = jax.random.normal(key2, (B, S, D), jnp.float32)
    v = jax.random.normal(key3, (B, S, D), jnp.float32)
    params = make_params(key4, D)
    out = jax.block_until_ready(multi_head_attention(q, k, v, params, H))
    ref = reference(q, k, v, params, H)
    assert out.shape == (B, S, D), out.shape
    assert jnp.allclose(out, ref, atol=1e-4, rtol=1e-4), "mismatch (small-head path)"

    # --- Case 2: lane-aligned head_dim (hd = 128) -> (B, H, KV) flash kernel --
    B2, S2, D2, H2 = 2, 256, 256, 2
    q2 = jax.random.normal(key5, (B2, S2, D2), jnp.float32)
    k2 = 0.5 * q2 + 0.1            # distinct tensors -> cross-attention path
    v2 = -0.25 * q2 + 0.2
    params2 = make_params(key6, D2)
    out2 = jax.block_until_ready(
        multi_head_attention(q2, k2, v2, params2, H2, kv_tile=128))  # 2 KV tiles
    ref2 = reference(q2, k2, v2, params2, H2)
    assert out2.shape == (B2, S2, D2), out2.shape
    assert jnp.allclose(out2, ref2, atol=2e-3, rtol=2e-3), "mismatch (flash path)"

    # --- Case 3: self-attention (q is k is v) -> fused QKV GEMM path --------
    out3 = jax.block_until_ready(
        multi_head_attention(q2, q2, q2, params2, H2, kv_tile=128))
    ref3 = reference(q2, q2, q2, params2, H2)
    assert jnp.allclose(out3, ref3, atol=2e-3, rtol=2e-3), "mismatch (fused QKV path)"

    print("KERNEL_OK")
</pallas_src>

<mosaic_0001>
module attributes {stable_mosaic.version = 11 : i64} {
  func.func @_linear_kernel(%arg0: i32, %arg1: i32, %arg2: i32, %arg3: memref<16x32xf32, #tpu.memory_space<vmem>>, %arg4: memref<32x32xf32, #tpu.memory_space<vmem>>, %arg5: memref<1x32xf32, #tpu.memory_space<vmem>>, %arg6: memref<16x32xf32, #tpu.memory_space<vmem>>, %arg7: memref<16x32xf32, #tpu.memory_space<vmem>>) attributes {dimension_semantics = [#tpu.dimension_semantics<parallel>, #tpu.dimension_semantics<parallel>, #tpu.dimension_semantics<arbitrary>], iteration_bounds = array<i64: 1, 1, 1>, scalar_prefetch = 0 : i64, scratch_operands = 1 : i64, tpu.core_type = #tpu.core_type<tc>, window_params = [{transform_indices = @transform_0, window_bounds = array<i64: 16, 32>}, {transform_indices = @transform_1, window_bounds = array<i64: 32, 32>}, {transform_indices = @transform_2, window_bounds = array<i64: 1, 32>}, {transform_indices = @transform_3, window_bounds = array<i64: 16, 32>}]} {
    %c0_i32 = arith.constant 0 : i32
    %0 = arith.cmpi eq, %arg2, %c0_i32 : i32
    %1 = arith.extui %0 : i1 to i32
    %c0_i32_0 = arith.constant 0 : i32
    %2 = arith.cmpi ne, %1, %c0_i32_0 : i32
    scf.if %2 {
      %cst_10 = arith.constant 0.000000e+00 : f32
      %12 = vector.broadcast %cst_10 : f32 to vector<16x32xf32>
      %c0_11 = arith.constant 0 : index
      %c0_12 = arith.constant 0 : index
      %13 = vector.load %arg7[%c0_11, %c0_12] : memref<16x32xf32, #tpu.memory_space<vmem>>, vector<16x32xf32>
      tpu.vector_store %arg7[%c0_11, %c0_12], %12 {strides = array<i32>} : memref<16x32xf32, #tpu.memory_space<vmem>>, vector<16x32xf32>,
    } else {
    }
    %c0 = arith.constant 0 : index
    %c0_1 = arith.constant 0 : index
    %3 = vector.load %arg7[%c0, %c0_1] : memref<16x32xf32, #tpu.memory_space<vmem>>, vector<16x32xf32>
    %c0_2 = arith.constant 0 : index
    %c0_3 = arith.constant 0 : index
    %4 = vector.load %arg3[%c0_2, %c0_3] : memref<16x32xf32, #tpu.memory_space<vmem>>, vector<16x32xf32>
    %c0_4 = arith.constant 0 : index
    %c0_5 = arith.constant 0 : index
    %5 = vector.load %arg4[%c0_4, %c0_5] : memref<32x32xf32, #tpu.memory_space<vmem>>, vector<32x32xf32>
    %cst = arith.constant dense<0.000000e+00> : vector<16x32xf32>
    %6 = tpu.matmul %4, %5, %cst {dimension_numbers = #tpu.dot_dimension_numbers<[1], [0], [0], [1], [0, 0, 1, 1], [], []>} : vector<16x32xf32>, vector<32x32xf32>, vector<16x32xf32> -> vector<16x32xf32>
    %7 = arith.addf %3, %6 : vector<16x32xf32>
    %c0_6 = arith.constant 0 : index
    %c0_7 = arith.constant 0 : index
    %8 = vector.load %arg7[%c0_6, %c0_7] : memref<16x32xf32, #tpu.memory_space<vmem>>, vector<16x32xf32>
    tpu.vector_store %arg7[%c0_6, %c0_7], %7 {strides = array<i32>} : memref<16x32xf32, #tpu.memory_space<vmem>>, vector<16x32xf32>,
    %c0_i32_8 = arith.constant 0 : i32
    %9 = arith.cmpi eq, %arg2, %c0_i32_8 : i32
    %10 = arith.extui %9 : i1 to i32
    %c0_i32_9 = arith.constant 0 : i32
    %11 = arith.cmpi ne, %10, %c0_i32_9 : i32
    scf.if %11 {
      %c0_10 = arith.constant 0 : index
      %c0_11 = arith.constant 0 : index
      %12 = vector.load %arg7[%c0_10, %c0_11] : memref<16x32xf32, #tpu.memory_space<vmem>>, vector<16x32xf32>
      %c0_12 = arith.constant 0 : index
      %c0_13 = arith.constant 0 : index
      %13 = vector.load %arg5[%c0_12, %c0_13] : memref<1x32xf32, #tpu.memory_space<vmem>>, vector<1x32xf32>
      %14 = vector.broadcast %13 : vector<1x32xf32> to vector<16x32xf32>
      %15 = arith.addf %12, %14 : vector<16x32xf32>
      %c0_14 = arith.constant 0 : index
      %c0_15 = arith.constant 0 : index
      %16 = vector.load %arg6[%c0_14, %c0_15] : memref<16x32xf32, #tpu.memory_space<vmem>>, vector<16x32xf32>
      tpu.vector_store %arg6[%c0_14, %c0_15], %15 {strides = array<i32>} : memref<16x32xf32, #tpu.memory_space<vmem>>, vector<16x32xf32>,
    } else {
    }
    return
  }
  func.func @transform_0(%arg0: i32, %arg1: i32, %arg2: i32) -> (i32, i32) {
    %c0_i32 = arith.constant 0 : i32
    return %arg0, %arg2 : i32, i32
  }
  func.func @transform_1(%arg0: i32, %arg1: i32, %arg2: i32) -> (i32, i32) {
    %c0_i32 = arith.constant 0 : i32
    return %arg2, %arg1 : i32, i32
  }
  func.func @transform_2(%arg0: i32, %arg1: i32, %arg2: i32) -> (i32, i32) {
    %c0_i32 = arith.constant 0 : i32
    %c0_i32_0 = arith.constant 0 : i32
    return %c0_i32, %arg1 : i32, i32
  }
  func.func @transform_3(%arg0: i32, %arg1: i32, %arg2: i32) -> (i32, i32) {
    %c0_i32 = arith.constant 0 : i32
    return %arg0, %arg1 : i32, i32
  }
}

</mosaic_0001>

<bundles_post_ra>
// kernel: tpu_custom_call.1
= control target key start
LH: loop header
LB: loop body
LE: loop exit
PB: predicated region body
PF: predicated region fallthrough
CT: control target
= control target key end

     0   :  { %8 = vsyncpa [#allocation4], 0  ;;  %s366_s0 = inlined_call_operand.hbm [shape: f32[16,32], index: 0, kind: input, shape index: {}]   ;;  %s367_s1 = inlined_call_operand.hbm [shape: f32[32,32], index: 1, kind: input, shape index: {}]   ;;  %s368_s2 = inlined_call_operand.vmem [shape: f32[1,32], index: 2, kind: input, shape index: {}]   ;;  %s369_s3 = inlined_call_operand.hbm [shape: f32[16,32], index: 3, kind: output, shape index: {}]  }
   0x1   :  { %9 = vsyncpa [#allocation7], 0 }
   0x2   :  { %10 = vsyncpa [#allocation5], 0  ;;  %s284_s12 = smov [#allocation3]   ;;  %s212_s16 = scalar_lea.hbm %s366_s0, 256 }
   0x3   :  { %s16_s13 = sshll.u32 %s284_s12, 4  ;;  %p213_p0 = scmp.ne.s32.totalorder %s366_s0, %s212_s16  ;;  %s17_s13 = int_to_ptr.vmem [resolvable:$true] %s16_s13 }
   0x4   :  { %p216_p1 = scmp.lt.u32.totalorder %s212_s16, %s366_s0 }
   0x6   :  { %p218_p2 = pnand %p216_p1, %p213_p0 }
   0x8   :  { %221 = shalt.err (!%p218_p2)
}
   0x9   :  { %s222_s21 = scalar_lea.vmem %s17_s13, 256  ;;  %p227_p4 = scmp.lt.s32.totalorder %s17_s13, %s17_s13 }
   0xa   :  { %p223_p3 = scmp.ne.s32.totalorder %s17_s13, %s222_s21  ;;  %p228_p5 = scmp.lt.s32.totalorder %s222_s21, %s222_s21 }
   0xc   :  { %p229_p6 = por %p228_p5, %p227_p4 }
   0xe   :  { %p230_p7 = pnand %p229_p6, %p223_p3 }
  0x10   :  { %233 = shalt.err (!%p230_p7)
}
  0x11   :  { %s285_s22 = smov 128   ;;  %s286_s23 = smov 8  }
  0x12   :  { %22 = dma.hbm_to_vmem [thread:$0]  %s366_s0, 256, %s17_s13, [#allocation4], %s285_s22, %s285_s22, %s286_s23  }
  0x13   :  { %s287_s26 = smov [#allocation6]   ;;  %s234_s30 = scalar_lea.hbm %s367_s1, 512 }
  0x14   :  { %s28_s27 = sshll.u32 %s287_s26, 4  ;;  %p235_p8 = scmp.ne.s32.totalorder %s367_s1, %s234_s30  ;;  %s29_s27 = int_to_ptr.vmem [resolvable:$true] %s28_s27 }
  0x15   :  { %p238_p9 = scmp.lt.u32.totalorder %s234_s30, %s367_s1 }
  0x17   :  { %p240_p10 = pnand %p238_p9, %p235_p8 }
  0x19   :  { %243 = shalt.err (!%p240_p10)
}
  0x1a   :  { %s244_s8 = scalar_lea.vmem %s29_s27, 512  ;;  %p249_p12 = scmp.lt.s32.totalorder %s29_s27, %s29_s27 }
  0x1b   :  { %p245_p11 = scmp.ne.s32.totalorder %s29_s27, %s244_s8  ;;  %p250_p13 = scmp.lt.s32.totalorder %s244_s8, %s244_s8 }
  0x1d   :  { %p251_p0 = por %p250_p13, %p249_p12 }
  0x1f   :  { %p252_p1 = pnand %p251_p0, %p245_p11 }
  0x21   :  { %255 = shalt.err (!%p252_p1)
}
  0x22   :  { %34 = dma.hbm_to_vmem [thread:$0]  %s367_s1, 512, %s29_s27, [#allocation7], %s285_s22, %s285_s22, %s286_s23  }
  0x23   :  { %278 = dma.done.wait [#allocation4], 256  }
  0x24   :  { %279 = vsyncadd [#allocation4], 4294967040 }
  0x25   :  { %280 = dma.done.wait [#allocation7], 512  }
  0x26   :  { %281 = vsyncadd [#allocation7], 4294966784  ;;  %vm47_vm0 = vcmask 261120   ;;  %v288_v0 = vmov 0.0   ;;  %v54_v1 = vld [vmem:[#allocation6] sm:$0xff]  ;;  %v55_v2 = vld [vmem:[#allocation6 + $0x8] sm:$0xff] }
  0x27   :  { %49 = vst.msk [vmem:[#allocation2 + $0x8] sm:$0xff] %vm47_vm0, %v288_v0  ;;  %48 = vst.msk [vmem:[#allocation2] sm:$0xff] %vm47_vm0, %v288_v0  ;;  %v56_v3 = vld [vmem:[#allocation6 + $0x10] sm:$0xff]  ;;  %v198_v4 = vpack.c.bf16 %v55_v2, %v54_v1  ;;  %v57_v5 = vld [vmem:[#allocation6 + $0x18] sm:$0xff]  ;;  %s289_s11 = smov [#allocation8]  }
  0x28   :  { %v52_v6 = vld [vmem:[#allocation3] sm:$0xff]  ;;  %v202_v7 = vpack.c.bf16 %v57_v5, %v56_v3  ;;  %v53_v8 = vld [vmem:[#allocation3 + $0x8] sm:$0xff]  ;;  %v180_v15 = vld [vmem:[%s368_s2] ss:$0 sm:$0xff]  ;;  %s165_s12 = sshll.u32 %s289_s11, 4  ;;  %s166_s12 = int_to_ptr.vmem [resolvable:$true] %s165_s12 }
  0x29   :  { %195 = vmatprep.mubr.msk.f32.mxu0 %vm47_vm0, %v52_v6  ;;  %199 = vmatprep.subr.bf16.mxu0 %v198_v4  ;;  %s256_s13 = scalar_lea.vmem %s166_s12, 256  ;;  %p261_p3 = scmp.lt.s32.totalorder %s166_s12, %s166_s12 }
  0x2a   :  { %201 = vmatpush3.bf16.msra.mxu0 %v198_v4  ;;  %p257_p2 = scmp.ne.s32.totalorder %s166_s12, %s256_s13  ;;  %p262_p4 = scmp.lt.s32.totalorder %s256_s13, %s256_s13 }
  0x2b   :  { %203 = vmatprep.subr.bf16.mxu0 %v202_v7 }
  0x2c   :  { %p263_p5 = por %p262_p4, %p261_p3 }
  0x2e   :  { %205 = vmatpush3.bf16.msra.mxu0 %v202_v7  ;;  %v51_v9 = vld [vmem:[#allocation2 + $0x8] sm:$0xff]  ;;  %v50_v10 = vld [vmem:[#allocation2] sm:$0xff]  ;;  %p264_p6 = pnand %p263_p5, %p257_p2 }
  0x31   :  { %196 = vmatmul.mubr.msk.f32.vlgmr.msra.gmra.mrb[0].mxu0 %vm47_vm0, %v53_v8 }
 0x104   :  { %v197_v11 = vpop.f32.mrb[0].mxu0 }
 0x105   :  { %v141_v12 = vadd.f32 %v197_v11, %v51_v9  ;;  %v131_v13 = vpop.f32.mrb[1].mxu0 }
 0x106   :  { %v140_v14 = vadd.f32 %v131_v13, %v50_v10 }
 0x107   :  { %143 = vst.msk [vmem:[#allocation2 + $0x8] sm:$0xff] %vm47_vm0, %v141_v12 }
 0x108   :  { %142 = vst.msk [vmem:[#allocation2] sm:$0xff] %vm47_vm0, %v140_v14 }
 0x10e   :  { %v148_v16 = vld [vmem:[#allocation2 + $0x8] sm:$0xff] }
 0x10f   :  { %v147_v17 = vld [vmem:[#allocation2] sm:$0xff]  ;;  %v157_v18 = vadd.f32 %v180_v15, %v148_v16 }
 0x110   :  { %v156_v19 = vadd.f32 %v180_v15, %v147_v17 }
 0x111   :  { %159 = vst.msk [vmem:[#allocation8 + $0x8] sm:$0xff] %vm47_vm0, %v157_v18 }
 0x112   :  { %158 = vst.msk [vmem:[#allocation8] sm:$0xff] %vm47_vm0, %v156_v19 }
 0x113   :  { %267 = shalt.err (!%p264_p6)
}
 0x114   :  { %s268_s15 = scalar_lea.hbm %s369_s3, 256 }
 0x115   :  { %p269_p7 = scmp.ne.s32.totalorder %s369_s3, %s268_s15  ;;  %p272_p8 = scmp.lt.u32.totalorder %s268_s15, %s369_s3 }
 0x117   :  { %p274_p9 = pnand %p272_p8, %p269_p7 }
 0x119   :  { %277 = shalt.err (!%p274_p9)
}
 0x11a   :  { %171 = dma.vmem_to_hbm [thread:$0]  %s166_s12, 256, %s369_s3, [#allocation5], %s285_s22, %s285_s22, %s286_s23  }
 0x11b   :  { %282 = dma.done.wait [#allocation5], 256  }
 0x11c   :  { %283 = vsyncadd [#allocation5], 4294967040 }
 0x11d   :  { %175 = vsyncpa [#allocation4], 1 }
 0x11e   :  { %176 = vsyncpa [#allocation7], 1 }
 0x11f   :  { %177 = vsyncpa [#allocation5], 1 }

</bundles_post_ra>
